<compile_context>
chip_gen: v6e
topology: v6e:2x2x1
jax: 0.10.0
libtpu: 0.0.40
codegen_flags: <defaults>
</compile_context>

<pallas_src>
import math

import jax
import jax.numpy as jnp
from jax import lax
from jax.experimental import pallas as pl
from jax.experimental.pallas import tpu as pltpu


# ----------------------------------------------------------------------------
# Slope construction (pure python scalar math, same as ALiBi._get_slopes).
# ----------------------------------------------------------------------------
def _get_slopes(n):
    def get_slopes_power_of_2(n):
        slope_ratio = 2 ** (-(2 ** (-(math.log2(n) - 3))))
        return [slope_ratio * slope_ratio ** i for i in range(n)]

    if math.log2(n).is_integer():
        return get_slopes_power_of_2(n)
    closest_power_of_2 = 2 ** math.floor(math.log2(n))
    base_slopes = get_slopes_power_of_2(closest_power_of_2)
    extra = _get_slopes(2 * closest_power_of_2)[0::2][: n - closest_power_of_2]
    return base_slopes + list(extra)


# ----------------------------------------------------------------------------
# Pallas kernel: one (1, TM, TN) output tile of the bias per grid step.
# ----------------------------------------------------------------------------
def _alibi_kernel(slopes_ref, out_ref):
    # slopes_ref: SMEM, shape (H,), slopes already multiplied by bias scale.
    # out_ref:    VMEM, shape (1, TM, TN) -- bias tile for (head, q-tile, k-tile).
    h = pl.program_id(0)
    ti = pl.program_id(1)
    tj = pl.program_id(2)
    tm = out_ref.shape[1]
    tn = out_ref.shape[2]

    # Global row/col indices for this tile (tile-local iota + grid offset).
    row = ti * tm + lax.broadcasted_iota(jnp.int32, (tm, tn), 0)
    col = tj * tn + lax.broadcasted_iota(jnp.int32, (tm, tn), 1)
    dist = -jnp.abs(row - col).astype(jnp.float32)  # -|i - j|

    slope = slopes_ref[h]  # f32 scalar (pre-scaled on host)
    out_ref[0, :, :] = (dist * slope).astype(out_ref.dtype)


def _choose_tiles(seq_len):
    """Lane-dense VMEM-friendly tile sizes, legal for any seq_len.

    Second-to-last dim: full-dim (always legal) or 512 (multiple of 8).
    Last dim:           full-dim (always legal) or 2048 (multiple of 128).
    Max tile = 512 * 2048 * 4 B = 4 MiB -> 8 MiB double-buffered, well under
    the scoped-VMEM defaults on v5e/v6e/v7x.
    """
    tm = seq_len if seq_len <= 512 else 512
    tn = seq_len if seq_len <= 2048 else 2048
    return tm, tn


def alibi_bias(num_heads, seq_len, max_seq_len, alibi_bias_scale=1.0,
               out_dtype=jnp.float32):
    """Returns bias of shape (num_heads, seq_len, seq_len)."""
    if seq_len > max_seq_len:
        raise ValueError(
            f"Sequence length {seq_len} exceeds maximum supported length "
            f"{max_seq_len}."
        )
    # Pre-scale slopes on the host: removes a per-tile multiply in the kernel.
    slopes = jnp.asarray(_get_slopes(num_heads), dtype=jnp.float32)
    slopes = slopes * jnp.float32(alibi_bias_scale)  # (H,)

    tm, tn = _choose_tiles(seq_len)
    grid = (num_heads, pl.cdiv(seq_len, tm), pl.cdiv(seq_len, tn))

    return pl.pallas_call(
        _alibi_kernel,
        out_shape=jax.ShapeDtypeStruct((num_heads, seq_len, seq_len), out_dtype),
        grid=grid,
        in_specs=[
            # Whole slopes vector, untiled, resident in SMEM for the full grid.
            pl.BlockSpec(memory_space=pltpu.MemorySpace.SMEM),
        ],
        out_specs=pl.BlockSpec((1, tm, tn), lambda h, i, j: (h, i, j)),
        compiler_params=pltpu.CompilerParams(
            dimension_semantics=("parallel", "parallel", "parallel"),
            vmem_limit_bytes=32 * 1024 * 1024,
        ),
    )(slopes)


# ----------------------------------------------------------------------------
# Module-like wrapper mirroring the PyTorch ALiBi cache behaviour, so the bias
# is not recomputed (and re-streamed from HBM) on every forward pass.
# TODO(synk): for best end-to-end perf, fuse -|i-j|*slope into the attention
# kernel per (q,k) tile instead of materializing (H, S, S) at all.
# ----------------------------------------------------------------------------
class ALiBi:
    def __init__(self, num_heads, max_seq_len, alibi_bias_scale=1.0,
                 out_dtype=jnp.float32):
        self.num_heads = num_heads
        self.max_seq_len = max_seq_len
        self.alibi_bias_scale = alibi_bias_scale
        self.out_dtype = out_dtype
        self._cached_bias = None
        self._cached_seq_len = 0

    def __call__(self, seq_len):
        if seq_len > self.max_seq_len:
            raise ValueError(
                f"Sequence length {seq_len} exceeds maximum supported length "
                f"{self.max_seq_len}."
            )
        if seq_len > self._cached_seq_len:
            new_len = min(max(seq_len, self._cached_seq_len * 2),
                          self.max_seq_len)
            self._cached_bias = alibi_bias(
                self.num_heads, new_len, self.max_seq_len,
                self.alibi_bias_scale, self.out_dtype)
            self._cached_seq_len = new_len
        return self._cached_bias[:, :seq_len, :seq_len]


# ----------------------------------------------------------------------------
# Pure-JAX reference matching the PyTorch forward semantics.
# ----------------------------------------------------------------------------
def alibi_bias_ref(num_heads, seq_len, alibi_bias_scale=1.0):
    slopes = jnp.asarray(_get_slopes(num_heads), dtype=jnp.float32)
    ar = jnp.arange(seq_len)
    bias = -jnp.abs(ar[None, :] - ar[:, None]).astype(jnp.float32)  # (S, S)
    bias = jnp.broadcast_to(bias[None], (num_heads, seq_len, seq_len))
    return bias * (slopes[:, None, None] * alibi_bias_scale)


if __name__ == "__main__":
    # Deterministic setup (module has no learnable weights; slopes are derived
    # analytically from num_heads).  Key kept for convention.
    _ = jax.random.PRNGKey(0)

    num_heads = 4
    max_seq_len = 16
    seq_len = 8
    alibi_bias_scale = 1.0

    # Direct kernel call.
    out = alibi_bias(num_heads, seq_len, max_seq_len, alibi_bias_scale)
    out = jax.block_until_ready(out)

    ref = alibi_bias_ref(num_heads, seq_len, alibi_bias_scale)
    assert out.shape == (num_heads, seq_len, seq_len), out.shape
    assert out.dtype == jnp.float32
    assert jnp.allclose(out, ref, atol=1e-6), "mismatch vs reference"

    # Cached module-style wrapper (mirrors nn.Module forward semantics).
    mod = ALiBi(num_heads, max_seq_len, alibi_bias_scale)
    out2 = jax.block_until_ready(mod(seq_len))
    assert out2.shape == (num_heads, seq_len, seq_len)
    assert jnp.allclose(out2, ref, atol=1e-6), "cached path mismatch"

    print("KERNEL_OK")
</pallas_src>

<mosaic_0001>
module attributes {stable_mosaic.version = 11 : i64} {
  func.func @_alibi_kernel(%arg0: i32, %arg1: i32, %arg2: i32, %arg3: memref<4xf32, #tpu.memory_space<smem>>, %arg4: memref<1x8x8xf32, #tpu.memory_space<vmem>>) attributes {dimension_semantics = [#tpu.dimension_semantics<parallel>, #tpu.dimension_semantics<parallel>, #tpu.dimension_semantics<parallel>], iteration_bounds = array<i64: 4, 1, 1>, scalar_prefetch = 0 : i64, scratch_operands = 0 : i64, tpu.core_type = #tpu.core_type<tc>, window_params = [{transform_indices = @transform_0, window_bounds = array<i64: 4>}, {transform_indices = @transform_1, window_bounds = array<i64: 1, 8, 8>}]} {
    %c8_i32 = arith.constant 8 : i32
    %0 = arith.muli %arg1, %c8_i32 : i32
    %1 = tpu.iota {dimensions = array<i32: 0>} : vector<8x8xi32>
    %2 = vector.broadcast %0 : i32 to vector<8x8xi32>
    %3 = arith.addi %2, %1 : vector<8x8xi32>
    %c8_i32_0 = arith.constant 8 : i32
    %4 = arith.muli %arg2, %c8_i32_0 : i32
    %5 = tpu.iota {dimensions = array<i32: 1>} : vector<8x8xi32>
    %6 = vector.broadcast %4 : i32 to vector<8x8xi32>
    %7 = arith.addi %6, %5 : vector<8x8xi32>
    %8 = arith.subi %3, %7 : vector<8x8xi32>
    %9 = math.absi %8 : vector<8x8xi32>
    %10 = arith.sitofp %9 : vector<8x8xi32> to vector<8x8xf32>
    %cst = arith.constant 0.000000e+00 : f32
    %11 = vector.broadcast %cst : f32 to vector<8x8xf32>
    %12 = arith.subf %11, %10 : vector<8x8xf32>
    %13 = arith.index_cast %arg0 : i32 to index
    %14 = memref.load %arg3[%13] : memref<4xf32, #tpu.memory_space<smem>>
    %15 = vector.broadcast %14 : f32 to vector<8x8xf32>
    %16 = arith.mulf %12, %15 : vector<8x8xf32>
    %c0 = arith.constant 0 : index
    %c0_1 = arith.constant 0 : index
    %c0_2 = arith.constant 0 : index
    %17 = vector.load %arg4[%c0, %c0_1, %c0_2] : memref<1x8x8xf32, #tpu.memory_space<vmem>>, vector<1x8x8xf32>
    %18 = vector.shape_cast %17 : vector<1x8x8xf32> to vector<8x8xf32>
    %19 = vector.shape_cast %16 : vector<8x8xf32> to vector<1x8x8xf32>
    tpu.vector_store %arg4[%c0, %c0_1, %c0_2], %19 {strides = array<i32>} : memref<1x8x8xf32, #tpu.memory_space<vmem>>, vector<1x8x8xf32>,
    return
  }
  func.func @transform_0(%arg0: i32, %arg1: i32, %arg2: i32) -> i32 {
    %c0_i32 = arith.constant 0 : i32
    %c0_i32_0 = arith.constant 0 : i32
    return %c0_i32 : i32
  }
  func.func @transform_1(%arg0: i32, %arg1: i32, %arg2: i32) -> (i32, i32, i32) {
    %c0_i32 = arith.constant 0 : i32
    return %arg0, %arg1, %arg2 : i32, i32, i32
  }
}

</mosaic_0001>

<bundles_post_ra>
// kernel: tpu_custom_call.1
= control target key start
LH: loop header
LB: loop body
LE: loop exit
PB: predicated region body
PF: predicated region fallthrough
CT: control target
= control target key end

     0   :  { %6 = vsyncpa [#allocation4], 0  ;;  %s520_s0 = inlined_call_operand.hbm [shape: f32[4], index: 0, kind: input, shape index: {}]   ;;  %s521_s1 = inlined_call_operand.hbm [shape: f32[4,8,8], index: 1, kind: output, shape index: {}]  }
   0x1   :  { %7 = vsyncpa [#allocation3], 0 }
   0x2   :  { %9 = vsyncpa [#allocation3 + $0x1], 0  ;;  %s422_s6 = smov 0   ;;  %s424_s7 = smov 0  }
   0x3   :  { %s426_s8 = smov 0   ;;  %s428_s9 = smov 0  }
   0x4   :  { %s430_s10 = smov 0   ;;  %s432_s11 = smov 0  }
   0x5 LB: > { %s239_s12 = sadd.s32 4294967295, %s408_s11   ;;  %s240_s13 = sadd.s32 4294967294, %s408_s11   ;;  %s408_s11 = sphi %s432_s11, %s15_s11   ;;  %s404_s10 = sphi %s430_s10, %s528_s10   ;;  %s400_s9 = sphi %s428_s9, %s527_s9   ;;  %s396_s8 = sphi %s426_s8, %s526_s8   ;;  %s392_s7 = sphi %s424_s7, %s525_s7   ;;  %s388_s6 = sphi %s422_s6, %s524_s6  }
   0x6   : > { %s34_s14 = sadd.s32 1, %s404_s10  ;;  %s66_s15 = sadd.s32 1, %s396_s8 }
   0x7   : > { %p36_p0 = scmp.ge.s32.totalorder %s34_s14, 4  ;;  %p76_p1 = scmp.ne.s32.totalorder %s396_s8, %s392_s7 }
   0x8   : > { %p77_p2 = scmp.eq.s32.totalorder %s239_s12, 3  ;;  %p82_p3 = scmp.ne.s32.totalorder %s392_s7, %s388_s6 }
   0x9   : > { %s530_s14 = smov (%p36_p0, %s34_s14), 0  ;;  %p83_p5 = scmp.eq.s32.totalorder %s240_s13, 3 }
   0xa   : > { %p462_p4 = por %p77_p2, %p76_p1  ;;  %s59_s17 = ssub.s32 %s404_s10, %s530_s14 }
   0xb   : > { %p241_p6 = scmp.ge.s32.totalorder %s408_s11, 1  ;;  %p64_p7 = scmp.eq.s32.totalorder %s59_s17, 0 }
   0xc   : > { %p469_p8 = por %p83_p5, %p82_p3  ;;  %p90_p9 = scmp.lt.s32.totalorder %s408_s11, 5 }
   0xd   : > { %s475_s19 = scalar_select %p64_p7, %s396_s8, %s66_s15  }
   0xe   : > { %p91_p10 = pnand %p241_p6, %p90_p9  ;;  %p265_p11 = scmp.eq.s32.totalorder %s239_s12, 0 }
   0xf   : > { %s410_s20 = smov [#allocation2]  }
  0x10   : > { %p257_p12 = pneg %p91_p10  ;;  %114 = sbr.rel (%p91_p10) target bundleno = 53 (0x35), region = 24 }
  0x12   : > { %p258_p13 = pnand %p265_p11, %p257_p12 }
  0x14   : > { %260 = dma.hbm_to_smem (!%p258_p13), %s520_s0, 16, %s410_s20, [#allocation4]  }
  0x15   : > { %379 = dma.done.wait (%p265_p11), [#allocation4], 16  }
  0x16   : > { %381 = vsyncadd (%p265_p11), [#allocation4], 4294967280 }
  0x17   : > { %120 = sfence }
  0x18   : > { %v131_v0 = vlaneseq  ;;  %s127_s23 = sand.u32 1, %s392_s7   ;;  %s146_s24 = sld [smem:[#allocation2 + %s400_s9]]  ;;  %vm149_vm0 = vcmask 64512  }
  0x19   : > { %s245_s25 = sshll.u32 %s127_s23, 3  ;;  %s248_s28 = sshll.u32 %s400_s9, 7 }
  0x1a   : > { %v132_v1 = vshrl.u32 %v131_v0, 7  ;;  %v137_v2 = vand.u32 127, %v131_v0  ;;  %s129_s26 = scalar_lea.vmem [#allocation5], %s245_s25  ;;  %s165_s2 = scalar_lea.hbm %s521_s1, %s248_s28 }
  0x1b   : > { %s167_s27 = sshll.u32 %s129_s26, 4  ;;  %s152_s3 = scalar_lea.sflag [#allocation3], %s127_s23  ;;  %s168_s27 = int_to_ptr.vmem [resolvable:$true] %s167_s27 }
  0x1c   : > { %v140_v3 = vsub.s32 %v132_v1, %v137_v2  ;;  %s328_s4 = scalar_lea.vmem %s168_s27, 128  ;;  %s411_s5 = smov [#allocation5]  }
  0x1d   : > { %p329_p0 = scmp.ne.s32.totalorder %s168_s27, %s328_s4  ;;  %s332_s12 = sshll.u32 %s411_s5, 4  ;;  %s333_s12 = int_to_ptr.vmem [resolvable:$false] %s332_s12 }
  0x1e   : > { %v142_v4 = vsub.s32 0, %v140_v3  ;;  %v147_v7 = vstv %s146_s24  ;;  %s334_s13 = scalar_lea.vmem %s333_s12, 256  ;;  %p335_p3 = scmp.lt.s32.totalorder %s168_s27, %s333_s12 }
  0x1f   : > { %p330_p1 = pnand %p329_p0, %p462_p4  ;;  %p336_p5 = scmp.lt.s32.totalorder %s334_s13, %s328_s4 }
  0x20   : > { %v246_v5 = vmin.u32 %v142_v4, %v140_v3 }
  0x21   : > { %p331_p2 = pneg %p330_p1  ;;  %p337_p6 = por %p336_p5, %p335_p3 }
  0x22   : > { %v144_v6 = vcvt.s32.f32 %v246_v5 }
  0x23   : > { %p338_p7 = pnand %p337_p6, %p331_p2 }
  0x24   : > { %v145_v8 = vsub.f32 0.0, %v144_v6 }
  0x26   : > { %v148_v9 = vmul.f32 %v147_v7, %v145_v8 }
  0x28   : > { %150 = vst.msk [vmem:[%s129_s26] sm:$0xff] %vm149_vm0, %v148_v9 }
  0x29   : > { %341 = shalt.err (!%p338_p7)
}
  0x2a   : > { %s342_s9 = scalar_lea.hbm %s165_s2, 128  ;;  %s346_s20 = scalar_lea.hbm %s521_s1, 512 }
  0x2b   : > { %p343_p9 = scmp.ne.s32.totalorder %s165_s2, %s342_s9  ;;  %p347_p12 = scmp.lt.s32.totalorder %s165_s2, %s521_s1 }
  0x2c   : > { %p348_p13 = scmp.lt.s32.totalorder %s346_s20, %s342_s9 }
  0x2d   : > { %p344_p10 = pnand %p343_p9, %p462_p4 }
  0x2e   : > { %p349_p0 = por %p348_p13, %p347_p12 }
  0x2f   : > { %p345_p11 = pneg %p344_p10 }
  0x31   : > { %p350_p1 = pnand %p349_p0, %p345_p11 }
  0x33   : > { %353 = shalt.err (!%p350_p1)
}
  0x34   : > { %255 = dma.vmem_to_hbm [thread:$0]  (%p462_p4), %s168_s27, 128, %s165_s2, %s152_s3  }
  0x35 PF: > { %p267_p2 = scmp.ge.s32.totalorder %s408_s11, 2  ;;  %s179_s23 = sand.u32 1, %s388_s6  }
  0x36   : > { %s180_s24 = scalar_lea.sflag [#allocation3], %s179_s23 }
  0x37   : > { %p262_p3 = pnand %p267_p2, %p469_p8 }
  0x39   : > { %p263_p5 = pneg %p262_p3 }
  0x3b   : > { %383 = dma.done.wait (%p263_p5), %s180_s24, 128  }
  0x3c   : > { %385 = vsyncadd (%p263_p5), %s180_s24, 4294967168  ;;  %s15_s11 = sadd.s32 1, %s408_s11   ;;  %s524_s6 = smov %s392_s7 }
  0x3d   : > { %p12_p6 = scmp.ge.s32.totalorder %s15_s11, 6   ;;  %s525_s7 = smov %s396_s8 }
  0x3e   : > { %s526_s8 = smov %s475_s19  ;;  %s527_s9 = smov %s404_s10 }
  0x3f   : > { %s528_s10 = smov %s530_s14  ;;  %14 = sbr.rel (!%p12_p6) target bundleno = 5 (0x5), region = 61 }
  0x44   :  { %185 = vsyncpa [#allocation3], 1 }
  0x45   :  { %187 = vsyncpa [#allocation3 + $0x1], 1 }
  0x46   :  { %188 = vsyncpa [#allocation4], 1 }
  0x47   :  { %190 = vsyncpa [#allocation4 + $0x1], 1 }

</bundles_post_ra>
